<compile_context>
chip_gen: v7x
topology: tpu7x:2x2x1
jax: 0.10.0
libtpu: 0.0.40
codegen_flags: <defaults>
</compile_context>

<pallas_src>
import functools

import jax
import jax.numpy as jnp
from jax import lax
from jax.experimental import pallas as pl
from jax.experimental.pallas import tpu as pltpu


def _fused_kernel(*refs, eps, m_total, l, tl, cache_z, use_sel, mask_tail):
    it = iter(refs)
    x_ref = next(it)
    sel_ref = next(it) if use_sel else None
    w_ref = next(it)
    g_ref = next(it)
    be_ref = next(it)
    o_ref = next(it)
    sum_acc = next(it)
    ssq_acc = next(it)
    scale_s = next(it)
    shift_s = next(it)
    z_cache = next(it) if cache_z else None

    p = pl.program_id(0)
    i = pl.program_id(1)
    j = pl.program_id(2)
    n_img = pl.num_programs(1)
    nl = pl.num_programs(2)

    def compute_z():
        x = x_ref[...]                                        # (Cin, TLx)
        if use_sel:
            # Spatial stride folded into a one-hot matmul (free MXU work in an
            # HBM-bound kernel; avoids a wrapper strided-slice HBM pass).
            x = jnp.dot(x, sel_ref[...], preferred_element_type=jnp.float32)
        return jnp.dot(w_ref[...], x, preferred_element_type=jnp.float32)  # (Cout, TL)

    # ------------------------ phase 0: statistics ------------------------
    @pl.when(jnp.logical_and(p == 0, jnp.logical_and(i == 0, j == 0)))
    def _init():
        sum_acc[...] = jnp.zeros_like(sum_acc)
        ssq_acc[...] = jnp.zeros_like(ssq_acc)

    @pl.when(p == 0)
    def _stats():
        z = compute_z()
        if mask_tail:
            lane = lax.broadcasted_iota(jnp.int32, z.shape, 1)
            z = jnp.where(j * tl + lane < l, z, 0.0)
        if cache_z:
            z_cache[i * nl + j] = z

        # Lane-preserving accumulation (VPU adds only; no per-tile XLU reduce).
        ncols = z.shape[1]
        nfull = ncols // 128
        rem = ncols - nfull * 128
        for s in range(nfull):
            blk = z[:, s * 128:(s + 1) * 128]
            sum_acc[...] += blk
            ssq_acc[...] += blk * blk
        if rem:
            blk = z[:, nfull * 128:]
            sum_acc[:, :rem] += blk
            ssq_acc[:, :rem] += blk * blk

    @pl.when(jnp.logical_and(p == 0,
                             jnp.logical_and(i == n_img - 1, j == nl - 1)))
    def _finalize():
        inv_m = jnp.float32(1.0 / m_total)
        s_tot = jnp.sum(sum_acc[...], axis=1, keepdims=True)   # (Cout, 1)
        q_tot = jnp.sum(ssq_acc[...], axis=1, keepdims=True)
        mean_z = s_tot * inv_m
        # One-pass variance; clamped against catastrophic cancellation.
        var = jnp.maximum(q_tot * inv_m - mean_z * mean_z, 0.0)
        scale = g_ref[...] * lax.rsqrt(var + eps)
        scale_s[...] = scale
        # Conv bias cancels in training-mode BN: shift = beta - mean_z * scale.
        shift_s[...] = be_ref[...] - mean_z * scale

    # ------------------------ phase 1: normalize -------------------------
    @pl.when(p == 1)
    def _normalize():
        if cache_z:
            z = z_cache[i * nl + j]
        else:
            z = compute_z()
        o_ref[...] = (z * scale_s[...] + shift_s[...]).astype(o_ref.dtype)


def _device_budgets():
    try:
        kind = jax.devices()[0].device_kind.lower()
    except Exception:
        kind = ""
    if ("v5" in kind) or ("v6" in kind):
        # 128 MiB physical VMEM parts: bigger tiles, bigger z-cache budget.
        return dict(tl_max=2048, vmem_limit=96 * 2 ** 20, cache_budget=64 * 2 ** 20)
    # v7x (64 MiB VMEM per TC) and conservative default.
    return dict(tl_max=1024, vmem_limit=48 * 2 ** 20, cache_budget=24 * 2 ** 20)


def single_conv_block(x, conv_w, conv_b, bn_gamma, bn_beta, *, stride,
                      eps=1e-5, force_no_cache=False):
    """Forward of SingleConvBlock: 1x1 Conv2d(+bias) then BatchNorm2d (train stats).

    x: (N, Cin, H, W) f32; conv_w: (Cout, Cin, 1, 1); conv_b/bn_gamma/bn_beta: (Cout,).
    conv_b is accepted for API parity but cancels exactly in training-mode BN.
    """
    del conv_b  # out = (z - mean_z)*scale + beta; the conv bias drops out.
    n, cin, h, w = x.shape
    cout = conv_w.shape[0]
    ho = (h - 1) // stride + 1
    wo = (w - 1) // stride + 1
    l = ho * wo

    budgets = _device_budgets()
    tl_max = budgets["tl_max"]

    w2 = conv_w.reshape(cout, cin).astype(jnp.float32)
    g2 = bn_gamma.reshape(cout, 1).astype(jnp.float32)
    be2 = bn_beta.reshape(cout, 1).astype(jnp.float32)

    use_sel = False
    sel = None
    if stride == 1:
        x3 = x.reshape(n, cin, h * w)            # free reshape, no HBM copy
        lx = l
    else:
        sel_bytes = h * w * l * 4
        slab_bytes = (cin * h * w + cout * l) * 4
        if sel_bytes <= 4 * 2 ** 20 and slab_bytes <= 8 * 2 ** 20:
            # Copy-free path: present the full (Cin, H*W) image and subsample
            # in-kernel with a one-hot selection matmul.
            use_sel = True
            x3 = x.reshape(n, cin, h * w)        # free reshape
            lx = h * w
            in_flat = (jnp.arange(ho) * stride)[:, None] * w \
                + (jnp.arange(wo) * stride)[None, :]
            in_flat = in_flat.reshape(-1)                               # (L,)
            sel = (jnp.arange(h * w)[:, None] == in_flat[None, :]).astype(jnp.float32)
        else:
            # TODO(synk): large strided inputs still pay one XLA strided-slice pass.
            xs = x[:, :, ::stride, ::stride]
            x3 = xs.reshape(n, cin, l)
            lx = l

    # L tiling: full-dim block when small (no pad, no mask); lane-dense tiles else.
    if use_sel or l <= tl_max:
        tl = l
        nl = 1
        mask_tail = False
    else:
        tl = tl_max                              # multiple of 128
        nl = pl.cdiv(l, tl)
        mask_tail = (l % tl) != 0
    tlx = lx if use_sel else tl

    m_total = n * l                              # true pixel count (no padding)

    # Fused-with-VMEM-z-cache vs recompute-in-phase-1 gating.
    z_cache_bytes = n * nl * cout * tl * 4
    work_bytes = 4 * (2 * (cin * tlx + cout * tl) + cout * cin + 2 * cout * 128)
    if use_sel:
        work_bytes += h * w * l * 4
    cache_z = (not force_no_cache) and \
        (z_cache_bytes + work_bytes <= budgets["cache_budget"])

    if cache_z:
        # Phase 1 reads z from VMEM: park the x index on a fixed block so no
        # extra x DMAs are issued during phase 1.
        x_map = lambda p_, i, j: (i * (1 - p_), 0, j * (1 - p_))
    else:
        x_map = lambda p_, i, j: (i, 0, j)

    in_specs = [pl.BlockSpec((None, cin, tlx), x_map)]
    inputs = [x3]
    if use_sel:
        in_specs.append(pl.BlockSpec((lx, tl), lambda p_, i, j: (0, 0)))
        inputs.append(sel)
    in_specs += [
        pl.BlockSpec((cout, cin), lambda p_, i, j: (0, 0)),
        pl.BlockSpec((cout, 1), lambda p_, i, j: (0, 0)),
        pl.BlockSpec((cout, 1), lambda p_, i, j: (0, 0)),
    ]
    inputs += [w2, g2, be2]

    # Output only written in phase 1; during phase 0 the index map parks on
    # block (0, 0), which phase 1 revisits first (one contiguous run, no
    # garbage ever survives to HBM).
    out_spec = pl.BlockSpec((None, cout, tl), lambda p_, i, j: (i * p_, 0, j * p_))

    scratch = [
        pltpu.VMEM((cout, 128), jnp.float32),    # lane-preserving sum accumulator
        pltpu.VMEM((cout, 128), jnp.float32),    # lane-preserving sum-of-squares
        pltpu.VMEM((cout, 1), jnp.float32),      # fused BN scale
        pltpu.VMEM((cout, 1), jnp.float32),      # fused BN shift
    ]
    if cache_z:
        scratch.append(pltpu.VMEM((n * nl, cout, tl), jnp.float32))

    kernel = functools.partial(
        _fused_kernel, eps=float(eps), m_total=float(m_total), l=l, tl=tl,
        cache_z=cache_z, use_sel=use_sel, mask_tail=mask_tail)

    out3 = pl.pallas_call(
        kernel,
        out_shape=jax.ShapeDtypeStruct((n, cout, l), jnp.float32),
        grid_spec=pltpu.PrefetchScalarGridSpec(
            num_scalar_prefetch=0,
            grid=(2, n, nl),
            in_specs=in_specs,
            out_specs=out_spec,
            scratch_shapes=scratch,
        ),
        compiler_params=pltpu.CompilerParams(
            # Phase ordering + shared accumulators/z-cache require sequential axes.
            dimension_semantics=("arbitrary", "arbitrary", "arbitrary"),
            vmem_limit_bytes=budgets["vmem_limit"],
        ),
    )(*inputs)

    return out3.reshape(n, cout, ho, wo)


def _reference(x, conv_w, conv_b, bn_gamma, bn_beta, *, stride, eps=1e-5):
    xs = x[:, :, ::stride, ::stride]
    y = jnp.einsum("nchw,oc->nohw", xs,
                   conv_w.reshape(conv_w.shape[0], conv_w.shape[1]))
    y = y + conv_b[None, :, None, None]
    mean = jnp.mean(y, axis=(0, 2, 3), keepdims=True)
    var = jnp.mean((y - mean) ** 2, axis=(0, 2, 3), keepdims=True)
    return (y - mean) / jnp.sqrt(var + eps) * bn_gamma[None, :, None, None] \
        + bn_beta[None, :, None, None]


if __name__ == "__main__":
    # SingleConvBlock(in_features=4, out_features=8, stride=2), small input.
    N, CIN, COUT, H, W, STRIDE = 2, 4, 8, 16, 16, 2

    key = jax.random.PRNGKey(0)
    kx, kw, kb = jax.random.split(key, 3)
    x = jax.random.normal(kx, (N, CIN, H, W), dtype=jnp.float32)

    # PyTorch-style deterministic init; fresh BatchNorm2d: gamma=1, beta=0.
    fan_in = CIN * 1 * 1
    bound = 1.0 / (fan_in ** 0.5)
    conv_w = jax.random.uniform(kw, (COUT, CIN, 1, 1), jnp.float32, -bound, bound)
    conv_b = jax.random.uniform(kb, (COUT,), jnp.float32, -bound, bound)
    bn_gamma = jnp.ones((COUT,), jnp.float32)
    bn_beta = jnp.zeros((COUT,), jnp.float32)

    def check(out, ref, tag):
        assert out.shape == ref.shape, (tag, out.shape, ref.shape)
        err = float(jnp.max(jnp.abs(out - ref)))
        assert jnp.allclose(out, ref, atol=1e-4, rtol=1e-4), (tag, err)

    # 1) The module's configuration: stride=2 (copy-free in-kernel subsample).
    fwd = jax.jit(functools.partial(single_conv_block, stride=STRIDE))
    out = jax.block_until_ready(fwd(x, conv_w, conv_b, bn_gamma, bn_beta))
    check(out, _reference(x, conv_w, conv_b, bn_gamma, bn_beta, stride=STRIDE), "stride2")
    assert out.shape == (N, COUT, H // STRIDE, W // STRIDE)

    # 2) stride=1 path (no selection matmul, single full-L block).
    fwd1 = jax.jit(functools.partial(single_conv_block, stride=1))
    out1 = jax.block_until_ready(fwd1(x, conv_w, conv_b, bn_gamma, bn_beta))
    check(out1, _reference(x, conv_w, conv_b, bn_gamma, bn_beta, stride=1), "stride1")

    # 3) L-tiled path with a ragged last tile (exercises in-kernel masking).
    xb = jax.random.normal(kx, (N, CIN, 48, 48), dtype=jnp.float32)
    outb = jax.block_until_ready(fwd1(xb, conv_w, conv_b, bn_gamma, bn_beta))
    check(outb, _reference(xb, conv_w, conv_b, bn_gamma, bn_beta, stride=1), "tiled")

    # 4) z-cache disabled: phase 1 recomputes z (large-activation fallback path).
    fwd_nc = jax.jit(functools.partial(single_conv_block, stride=STRIDE,
                                       force_no_cache=True))
    outnc = jax.block_until_ready(fwd_nc(x, conv_w, conv_b, bn_gamma, bn_beta))
    check(outnc, _reference(x, conv_w, conv_b, bn_gamma, bn_beta, stride=STRIDE),
          "nocache")

    print("KERNEL_OK")
</pallas_src>

<mosaic_0001>
module attributes {stable_mosaic.version = 11 : i64} {
  func.func @_fused_kernel(%arg0: i32, %arg1: i32, %arg2: i32, %arg3: memref<1x4x256xf32, #tpu.memory_space<vmem>>, %arg4: memref<256x64xf32, #tpu.memory_space<vmem>>, %arg5: memref<8x4xf32, #tpu.memory_space<vmem>>, %arg6: memref<8x1xf32, #tpu.memory_space<vmem>>, %arg7: memref<8x1xf32, #tpu.memory_space<vmem>>, %arg8: memref<1x8x64xf32, #tpu.memory_space<vmem>>, %arg9: memref<8x128xf32, #tpu.memory_space<vmem>>, %arg10: memref<8x128xf32, #tpu.memory_space<vmem>>, %arg11: memref<8x1xf32, #tpu.memory_space<vmem>>, %arg12: memref<8x1xf32, #tpu.memory_space<vmem>>, %arg13: memref<2x8x64xf32, #tpu.memory_space<vmem>>) attributes {dimension_semantics = [#tpu.dimension_semantics<arbitrary>, #tpu.dimension_semantics<arbitrary>, #tpu.dimension_semantics<arbitrary>], iteration_bounds = array<i64: 2, 2, 1>, scalar_prefetch = 0 : i64, scratch_operands = 5 : i64, tpu.core_type = #tpu.core_type<tc>, window_params = [{transform_indices = @transform_0, window_bounds = array<i64: 1, 4, 256>}, {pipeline_mode = #tpu.pipeline_mode<synchronous>, transform_indices = @transform_1, window_bounds = array<i64: 256, 64>}, {pipeline_mode = #tpu.pipeline_mode<synchronous>, transform_indices = @transform_2, window_bounds = array<i64: 8, 4>}, {pipeline_mode = #tpu.pipeline_mode<synchronous>, transform_indices = @transform_3, window_bounds = array<i64: 8, 1>}, {pipeline_mode = #tpu.pipeline_mode<synchronous>, transform_indices = @transform_4, window_bounds = array<i64: 8, 1>}, {transform_indices = @transform_5, window_bounds = array<i64: 1, 8, 64>}]} {
    %c0_i32 = arith.constant 0 : i32
    %0 = arith.cmpi eq, %arg0, %c0_i32 : i32
    %c0_i32_0 = arith.constant 0 : i32
    %1 = arith.cmpi eq, %arg1, %c0_i32_0 : i32
    %c0_i32_1 = arith.constant 0 : i32
    %2 = arith.cmpi eq, %arg2, %c0_i32_1 : i32
    %3 = arith.andi %1, %2 : i1
    %4 = arith.andi %0, %3 : i1
    %5 = arith.extui %4 : i1 to i32
    %c0_i32_2 = arith.constant 0 : i32
    %6 = arith.cmpi ne, %5, %c0_i32_2 : i32
    scf.if %6 {
      %cst = arith.constant 0.000000e+00 : f32
      %20 = vector.broadcast %cst : f32 to vector<8x128xf32>
      %c0 = arith.constant 0 : index
      %c0_10 = arith.constant 0 : index
      %21 = vector.load %arg9[%c0, %c0_10] : memref<8x128xf32, #tpu.memory_space<vmem>>, vector<8x128xf32>
      tpu.vector_store %arg9[%c0, %c0_10], %20 {strides = array<i32>} : memref<8x128xf32, #tpu.memory_space<vmem>>, vector<8x128xf32>,
      %cst_11 = arith.constant 0.000000e+00 : f32
      %22 = vector.broadcast %cst_11 : f32 to vector<8x128xf32>
      %c0_12 = arith.constant 0 : index
      %c0_13 = arith.constant 0 : index
      %23 = vector.load %arg10[%c0_12, %c0_13] : memref<8x128xf32, #tpu.memory_space<vmem>>, vector<8x128xf32>
      tpu.vector_store %arg10[%c0_12, %c0_13], %22 {strides = array<i32>} : memref<8x128xf32, #tpu.memory_space<vmem>>, vector<8x128xf32>,
    } else {
    }
    %c0_i32_3 = arith.constant 0 : i32
    %7 = arith.cmpi eq, %arg0, %c0_i32_3 : i32
    %8 = arith.extui %7 : i1 to i32
    %c0_i32_4 = arith.constant 0 : i32
    %9 = arith.cmpi ne, %8, %c0_i32_4 : i32
    scf.if %9 {
      %c0 = arith.constant 0 : index
      %c0_10 = arith.constant 0 : index
      %c0_11 = arith.constant 0 : index
      %20 = vector.load %arg3[%c0, %c0_10, %c0_11] : memref<1x4x256xf32, #tpu.memory_space<vmem>>, vector<1x4x256xf32>
      %21 = vector.shape_cast %20 : vector<1x4x256xf32> to vector<4x256xf32>
      %c0_12 = arith.constant 0 : index
      %c0_13 = arith.constant 0 : index
      %22 = vector.load %arg4[%c0_12, %c0_13] : memref<256x64xf32, #tpu.memory_space<vmem>>, vector<256x64xf32>
      %cst = arith.constant dense<0.000000e+00> : vector<4x64xf32>
      %23 = tpu.matmul %21, %22, %cst {dimension_numbers = #tpu.dot_dimension_numbers<[1], [0], [0], [1], [0, 0, 1, 1], [], []>} : vector<4x256xf32>, vector<256x64xf32>, vector<4x64xf32> -> vector<4x64xf32>
      %c0_14 = arith.constant 0 : index
      %c0_15 = arith.constant 0 : index
      %24 = vector.load %arg5[%c0_14, %c0_15] : memref<8x4xf32, #tpu.memory_space<vmem>>, vector<8x4xf32>
      %cst_16 = arith.constant dense<0.000000e+00> : vector<8x64xf32>
      %25 = tpu.matmul %24, %23, %cst_16 {dimension_numbers = #tpu.dot_dimension_numbers<[1], [0], [0], [1], [0, 0, 1, 1], [], []>} : vector<8x4xf32>, vector<4x64xf32>, vector<8x64xf32> -> vector<8x64xf32>
      %c1_i32_17 = arith.constant 1 : i32
      %26 = arith.muli %arg1, %c1_i32_17 : i32
      %27 = arith.addi %26, %arg2 : i32
      %28 = arith.index_cast %27 : i32 to index
      %c0_18 = arith.constant 0 : index
      %c0_19 = arith.constant 0 : index
      %29 = vector.load %arg13[%28, %c0_18, %c0_19] : memref<2x8x64xf32, #tpu.memory_space<vmem>>, vector<1x8x64xf32>
      %30 = vector.shape_cast %29 : vector<1x8x64xf32> to vector<8x64xf32>
      %31 = vector.shape_cast %25 : vector<8x64xf32> to vector<1x8x64xf32>
      tpu.vector_store %arg13[%28, %c0_18, %c0_19], %31 {strides = array<i32>} : memref<2x8x64xf32, #tpu.memory_space<vmem>>, vector<1x8x64xf32>,
      %c0_20 = arith.constant 0 : index
      %c0_21 = arith.constant 0 : index
      %32 = vector.load %arg9[%c0_20, %c0_21] : memref<8x128xf32, #tpu.memory_space<vmem>>, vector<8x64xf32>
      %33 = arith.addf %32, %25 : vector<8x64xf32>
      %c0_22 = arith.constant 0 : index
      %c0_23 = arith.constant 0 : index
      %34 = vector.load %arg9[%c0_22, %c0_23] : memref<8x128xf32, #tpu.memory_space<vmem>>, vector<8x64xf32>
      tpu.vector_store %arg9[%c0_22, %c0_23], %33 {strides = array<i32>} : memref<8x128xf32, #tpu.memory_space<vmem>>, vector<8x64xf32>,
      %c0_24 = arith.constant 0 : index
      %c0_25 = arith.constant 0 : index
      %35 = vector.load %arg10[%c0_24, %c0_25] : memref<8x128xf32, #tpu.memory_space<vmem>>, vector<8x64xf32>
      %36 = arith.mulf %25, %25 : vector<8x64xf32>
      %37 = arith.addf %35, %36 : vector<8x64xf32>
      %c0_26 = arith.constant 0 : index
      %c0_27 = arith.constant 0 : index
      %38 = vector.load %arg10[%c0_26, %c0_27] : memref<8x128xf32, #tpu.memory_space<vmem>>, vector<8x64xf32>
      tpu.vector_store %arg10[%c0_26, %c0_27], %37 {strides = array<i32>} : memref<8x128xf32, #tpu.memory_space<vmem>>, vector<8x64xf32>,
    } else {
    }
    %c0_i32_5 = arith.constant 0 : i32
    %10 = arith.cmpi eq, %arg0, %c0_i32_5 : i32
    %c1_i32 = arith.constant 1 : i32
    %11 = arith.cmpi eq, %arg1, %c1_i32 : i32
    %c0_i32_6 = arith.constant 0 : i32
    %12 = arith.cmpi eq, %arg2, %c0_i32_6 : i32
    %13 = arith.andi %11, %12 : i1
    %14 = arith.andi %10, %13 : i1
    %15 = arith.extui %14 : i1 to i32
    %c0_i32_7 = arith.constant 0 : i32
    %16 = arith.cmpi ne, %15, %c0_i32_7 : i32
    scf.if %16 {
      %c0 = arith.constant 0 : index
      %c0_10 = arith.constant 0 : index
      %20 = vector.load %arg9[%c0, %c0_10] : memref<8x128xf32, #tpu.memory_space<vmem>>, vector<8x128xf32>
      %cst = arith.constant dense<0.000000e+00> : vector<8xf32>
      %21 = vector.multi_reduction <add>, %20, %cst [1] : vector<8x128xf32> to vector<8xf32>
      %22 = vector.shape_cast %21 : vector<8xf32> to vector<8x1xf32>
      %c0_11 = arith.constant 0 : index
      %c0_12 = arith.constant 0 : index
      %23 = vector.load %arg10[%c0_11, %c0_12] : memref<8x128xf32, #tpu.memory_space<vmem>>, vector<8x128xf32>
      %cst_13 = arith.constant dense<0.000000e+00> : vector<8xf32>
      %24 = vector.multi_reduction <add>, %23, %cst_13 [1] : vector<8x128xf32> to vector<8xf32>
      %25 = vector.shape_cast %24 : vector<8xf32> to vector<8x1xf32>
      %cst_14 = arith.constant 7.812500e-03 : f32
      %26 = vector.broadcast %cst_14 : f32 to vector<8x1xf32>
      %27 = arith.mulf %22, %26 : vector<8x1xf32>
      %cst_15 = arith.constant 7.812500e-03 : f32
      %28 = vector.broadcast %cst_15 : f32 to vector<8x1xf32>
      %29 = arith.mulf %25, %28 : vector<8x1xf32>
      %30 = arith.mulf %27, %27 : vector<8x1xf32>
      %31 = arith.subf %29, %30 : vector<8x1xf32>
      %cst_16 = arith.constant 0.000000e+00 : f32
      %32 = vector.broadcast %cst_16 : f32 to vector<8x1xf32>
      %33 = arith.maximumf %31, %32 : vector<8x1xf32>
      %c0_17 = arith.constant 0 : index
      %c0_18 = arith.constant 0 : index
      %34 = vector.load %arg6[%c0_17, %c0_18] : memref<8x1xf32, #tpu.memory_space<vmem>>, vector<8x1xf32>
      %cst_19 = arith.constant 9.99999974E-6 : f32
      %35 = vector.broadcast %cst_19 : f32 to vector<8x1xf32>
      %36 = arith.addf %33, %35 : vector<8x1xf32>
      %37 = math.rsqrt %36 : vector<8x1xf32>
      %38 = arith.mulf %34, %37 : vector<8x1xf32>
      %c0_20 = arith.constant 0 : index
      %c0_21 = arith.constant 0 : index
      %39 = vector.load %arg11[%c0_20, %c0_21] : memref<8x1xf32, #tpu.memory_space<vmem>>, vector<8x1xf32>
      tpu.vector_store %arg11[%c0_20, %c0_21], %38 {strides = array<i32>} : memref<8x1xf32, #tpu.memory_space<vmem>>, vector<8x1xf32>,
      %c0_22 = arith.constant 0 : index
      %c0_23 = arith.constant 0 : index
      %40 = vector.load %arg7[%c0_22, %c0_23] : memref<8x1xf32, #tpu.memory_space<vmem>>, vector<8x1xf32>
      %41 = arith.mulf %27, %38 : vector<8x1xf32>
      %42 = arith.subf %40, %41 : vector<8x1xf32>
      %c0_24 = arith.constant 0 : index
      %c0_25 = arith.constant 0 : index
      %43 = vector.load %arg12[%c0_24, %c0_25] : memref<8x1xf32, #tpu.memory_space<vmem>>, vector<8x1xf32>
      tpu.vector_store %arg12[%c0_24, %c0_25], %42 {strides = array<i32>} : memref<8x1xf32, #tpu.memory_space<vmem>>, vector<8x1xf32>,
    } else {
    }
    %c1_i32_8 = arith.constant 1 : i32
    %17 = arith.cmpi eq, %arg0, %c1_i32_8 : i32
    %18 = arith.extui %17 : i1 to i32
    %c0_i32_9 = arith.constant 0 : i32
    %19 = arith.cmpi ne, %18, %c0_i32_9 : i32
    scf.if %19 {
      %c1_i32_10 = arith.constant 1 : i32
      %20 = arith.muli %arg1, %c1_i32_10 : i32
      %21 = arith.addi %20, %arg2 : i32
      %22 = arith.index_cast %21 : i32 to index
      %c0 = arith.constant 0 : index
      %c0_11 = arith.constant 0 : index
      %23 = vector.load %arg13[%22, %c0, %c0_11] : memref<2x8x64xf32, #tpu.memory_space<vmem>>, vector<1x8x64xf32>
      %24 = vector.shape_cast %23 : vector<1x8x64xf32> to vector<8x64xf32>
      %c0_12 = arith.constant 0 : index
      %c0_13 = arith.constant 0 : index
      %25 = vector.load %arg11[%c0_12, %c0_13] : memref<8x1xf32, #tpu.memory_space<vmem>>, vector<8x1xf32>
      %26 = vector.broadcast %25 : vector<8x1xf32> to vector<8x64xf32>
      %27 = arith.mulf %24, %26 : vector<8x64xf32>
      %c0_14 = arith.constant 0 : index
      %c0_15 = arith.constant 0 : index
      %28 = vector.load %arg12[%c0_14, %c0_15] : memref<8x1xf32, #tpu.memory_space<vmem>>, vector<8x1xf32>
      %29 = vector.broadcast %28 : vector<8x1xf32> to vector<8x64xf32>
      %30 = arith.addf %27, %29 : vector<8x64xf32>
      %c0_16 = arith.constant 0 : index
      %c0_17 = arith.constant 0 : index
      %c0_18 = arith.constant 0 : index
      %31 = vector.load %arg8[%c0_16, %c0_17, %c0_18] : memref<1x8x64xf32, #tpu.memory_space<vmem>>, vector<1x8x64xf32>
      %32 = vector.shape_cast %31 : vector<1x8x64xf32> to vector<8x64xf32>
      %33 = vector.shape_cast %30 : vector<8x64xf32> to vector<1x8x64xf32>
      tpu.vector_store %arg8[%c0_16, %c0_17, %c0_18], %33 {strides = array<i32>} : memref<1x8x64xf32, #tpu.memory_space<vmem>>, vector<1x8x64xf32>,
    } else {
    }
    return
  }
  func.func @transform_0(%arg0: i32, %arg1: i32, %arg2: i32) -> (i32, i32, i32) {
    %c1_i32 = arith.constant 1 : i32
    %0 = arith.subi %c1_i32, %arg0 : i32
    %1 = arith.muli %arg1, %0 : i32
    %c1_i32_0 = arith.constant 1 : i32
    %2 = arith.subi %c1_i32_0, %arg0 : i32
    %3 = arith.muli %arg2, %2 : i32
    %c0_i32 = arith.constant 0 : i32
    %c0_i32_1 = arith.constant 0 : i32
    return %1, %c0_i32, %3 : i32, i32, i32
  }
  func.func @transform_1(%arg0: i32, %arg1: i32, %arg2: i32) -> (i32, i32) {
    %c0_i32 = arith.constant 0 : i32
    %c0_i32_0 = arith.constant 0 : i32
    %c0_i32_1 = arith.constant 0 : i32
    return %c0_i32, %c0_i32_0 : i32, i32
  }
  func.func @transform_2(%arg0: i32, %arg1: i32, %arg2: i32) -> (i32, i32) {
    %c0_i32 = arith.constant 0 : i32
    %c0_i32_0 = arith.constant 0 : i32
    %c0_i32_1 = arith.constant 0 : i32
    return %c0_i32, %c0_i32_0 : i32, i32
  }
  func.func @transform_3(%arg0: i32, %arg1: i32, %arg2: i32) -> (i32, i32) {
    %c0_i32 = arith.constant 0 : i32
    %c0_i32_0 = arith.constant 0 : i32
    %c0_i32_1 = arith.constant 0 : i32
    return %c0_i32, %c0_i32_0 : i32, i32
  }
  func.func @transform_4(%arg0: i32, %arg1: i32, %arg2: i32) -> (i32, i32) {
    %c0_i32 = arith.constant 0 : i32
    %c0_i32_0 = arith.constant 0 : i32
    %c0_i32_1 = arith.constant 0 : i32
    return %c0_i32, %c0_i32_0 : i32, i32
  }
  func.func @transform_5(%arg0: i32, %arg1: i32, %arg2: i32) -> (i32, i32, i32) {
    %0 = arith.muli %arg1, %arg0 : i32
    %1 = arith.muli %arg2, %arg0 : i32
    %c0_i32 = arith.constant 0 : i32
    %c0_i32_0 = arith.constant 0 : i32
    return %0, %c0_i32, %1 : i32, i32, i32
  }
}

</mosaic_0001>

<bundles_post_ra>
// kernel: single_conv_block.1
= control target key start
LH: loop header
LB: loop body
LE: loop exit
PB: predicated region body
PF: predicated region fallthrough
CT: control target
= control target key end

     0   :  { %s873_s18 = smov 0   ;;  %s875_s19 = smov 0   ;;  %s1054_s0 = inlined_call_operand.vmem [shape: f32[2,4,256], index: 0, kind: input, shape index: {}]   ;;  %s1055_s1 = inlined_call_operand.vmem [shape: f32[256,64], index: 1, kind: input, shape index: {}]   ;;  %s1056_s2 = inlined_call_operand.vmem [shape: f32[8,4], index: 2, kind: input, shape index: {}]   ;;  %s1057_s3 = inlined_call_operand.vmem [shape: f32[8,1], index: 3, kind: input, shape index: {}]   ;;  %s1058_s4 = inlined_call_operand.vmem [shape: f32[8,1], index: 4, kind: input, shape index: {}]   ;;  %s1059_s5 = inlined_call_operand.vmem [shape: f32[2,8,64], index: 5, kind: output, shape index: {}]  }
   0x1   :  { %s877_s20 = smov 0   ;;  %s879_s21 = smov 0  }
   0x2   :  { %s881_s22 = smov 0  }
   0x3 LB: > { %s30_s23 = sadd.s32 1, %s829_s20  ;;  %s34_s24 = sadd.s32 1, %s833_s21  ;;  %s837_s22 = sphi %s881_s22, %s15_s22   ;;  %s833_s21 = sphi %s879_s21, %s1063_s21   ;;  %s829_s20 = sphi %s877_s20, %s1062_s20   ;;  %s825_s19 = sphi %s875_s19, %s1061_s19   ;;  %s821_s18 = sphi %s873_s18, %s1060_s18  }
   0x4   : > { %p32_p0 = scmp.ge.s32.totalorder %s30_s23, 2  ;;  %p660_p1 = scmp.ge.s32.totalorder %s837_s22, 1 }
   0x5   : > { %p231_p2 = scmp.lt.s32.totalorder %s837_s22, 5 }
   0x6   : > { %s1065_s23 = smov (%p32_p0, %s30_s23), 0  ;;  %s1067_s24 = smov (!%p32_p0, %s34_s24), %s833_s21 }
   0x7   : > { %p232_p3 = pnand %p660_p1, %p231_p2  ;;  %p36_p4 = scmp.ge.s32.totalorder %s1067_s24, 2 }
   0x8   : > { %s270_s25 = ssub.s32 (!%p232_p3), 1, %s825_s19  ;;  %s286_s26 = smul.u32 (!%p232_p3), %s821_s18, %s825_s19 }
   0x9   : > { %s1069_s24 = smov (%p36_p4, %s1067_s24), 0  ;;  %235 = sbr.rel (%p232_p3) target bundleno = 810 (0x32a), region = 40 }
   0xa   : > { %s271_s27 = smul.u32 (!%p232_p3), %s821_s18, %s270_s25  ;;  %p297_p5 = scmp.eq.s32.totalorder (!%p232_p3), %s825_s19, 0 }
   0xb   : > { %p288_p6 = scmp.lt.s32.totalorder (!%p232_p3), %s286_s26, 1  ;;  %p298_p7 = scmp.eq.s32.totalorder (!%p232_p3), %s821_s18, 0 }
   0xc   : > { %p274_p8 = scmp.lt.s32.totalorder (!%p232_p3), %s271_s27, 1 }
   0xd   : > { %p302_p9 = pnand (!%p232_p3), %p298_p7, %p297_p5 }
  0x10   : > { %s1071_s26 = smov (!%p288_p6, %s286_s26), 1  ;;  %s1073_s27 = smov (!%p274_p8, %s271_s27), 1 }
  0x11   : > { %s663_s28 = sshll.u32 %s1071_s26, 3  ;;  %s674_s29 = sshll.u32 %s1073_s27, 3  ;;  %v839_v0 = vmov (!%p302_p9), 0.0  }
  0x12   : > { %s918_s7 = scalar_lea.vmem %s1059_s5, %s663_s28  ;;  %s923_s10 = scalar_lea.vmem %s1054_s0, %s674_s29  ;;  %306 = vst [vmem:[#allocation2] sm:$0xff] (!%p302_p9), %v839_v0  ;;  %307 = vst [vmem:[#allocation3] sm:$0xff] (!%p302_p9), %v839_v0 }
  0x13   : > { %305 = sbr.rel (%p302_p9) target bundleno = 26 (0x1a), region = 44 }
  0x1a PF: > { %p665_p10 = scmp.ne.s32.totalorder %s825_s19, 0 }
  0x1b   : > { %v328_v1 = vld [vmem:[%s1055_s1 + $0x80] sm:$0xff] (!%p665_p10)  ;;  %v329_v2 = vld [vmem:[%s1055_s1 + $0x88] sm:$0xff] (!%p665_p10)  ;;  %v330_v6 = vld [vmem:[%s1055_s1 + $0x90] sm:$0xff] (!%p665_p10)  ;;  %v840_v51 = vmov (!%p665_p10), 0.0   ;;  %vm841_vm0 = vmmov (!%p665_p10), 0   ;;  %vm422_vm1 = vcmask (!%p665_p10), 1043456  }
  0x1c   : > { %310 = sbr.rel (%p665_p10) target bundleno = 495 (0x1ef), region = 48  ;;  %v312_v3 = vld [vmem:[%s1055_s1] sm:$0xff] (!%p665_p10)  ;;  %v719_v4 = vpack.c.bf16 (!%p665_p10), %v329_v2, %v328_v1  ;;  %v313_v5 = vld [vmem:[%s1055_s1 + $0x8] sm:$0xff] (!%p665_p10)  ;;  %v331_v7 = vld [vmem:[%s1055_s1 + $0x98] sm:$0xff] (!%p665_p10)  ;;  %714 = vmatprep.subr.mxu1 (!%p665_p10), %v840_v51  ;;  %716 = vmatprep.mubr.msk.f32.mxu1 (!%p665_p10), %vm841_vm0, %v840_v51  ;;  %vm418_vm2 = vcmask (!%p665_p10), 31744   ;;  %s668_s11 = sshll.u32 (!%p665_p10), %s821_s18, 3 }
  0x1d   : > { %v721_v8 = vpack.c.bf16 (!%p665_p10), %v313_v5, %v312_v3  ;;  %v723_v9 = vpack.c.bf16 (!%p665_p10), %v331_v7, %v330_v6  ;;  %v314_v10 = vld [vmem:[%s1055_s1 + $0x10] sm:$0xff] (!%p665_p10)  ;;  %v315_v11 = vld [vmem:[%s1055_s1 + $0x18] sm:$0xff] (!%p665_p10)  ;;  %v332_v12 = vld [vmem:[%s1055_s1 + $0xa0] sm:$0xff] (!%p665_p10)  ;;  %vm499_vm3 = vcmask (!%p665_p10), 523264   ;;  %s498_s12 = scalar_lea.vmem (!%p665_p10), [#allocation6], %s668_s11 }
  0x1e   : > { %720 = vmatprep.subr.bf16.mxu0 (!%p665_p10), %v719_v4  ;;  %v333_v13 = vld [vmem:[%s1055_s1 + $0xa8] sm:$0xff] (!%p665_p10)  ;;  %v725_v14 = vpack.c.bf16 (!%p665_p10), %v315_v11, %v314_v10  ;;  %v316_v16 = vld [vmem:[%s1055_s1 + $0x20] sm:$0xff] (!%p665_p10)  ;;  %v334_v18 = vld [vmem:[%s1055_s1 + $0xb0] sm:$0xff] (!%p665_p10) }
  0x1f   : > { %722 = vmatpush3.bf16.msra.mxu0 (!%p665_p10), %v721_v8  ;;  %v727_v15 = vpack.c.bf16 (!%p665_p10), %v333_v13, %v332_v12  ;;  %v317_v17 = vld [vmem:[%s1055_s1 + $0x28] sm:$0xff] (!%p665_p10)  ;;  %v335_v19 = vld [vmem:[%s1055_s1 + $0xb8] sm:$0xff] (!%p665_p10)  ;;  %v318_v22 = vld [vmem:[%s1055_s1 + $0x30] sm:$0xff] (!%p665_p10) }
  0x20   : > { %724 = vmatprep.subr.bf16.mxu0 (!%p665_p10), %v723_v9  ;;  %v729_v20 = vpack.c.bf16 (!%p665_p10), %v317_v17, %v316_v16  ;;  %v731_v21 = vpack.c.bf16 (!%p665_p10), %v335_v19, %v334_v18  ;;  %v319_v23 = vld [vmem:[%s1055_s1 + $0x38] sm:$0xff] (!%p665_p10)  ;;  %v336_v24 = vld [vmem:[%s1055_s1 + $0xc0] sm:$0xff] (!%p665_p10)  ;;  %v337_v25 = vld [vmem:[%s1055_s1 + $0xc8] sm:$0xff] (!%p665_p10) }
  0x21   : > { %v311_v26 = vld [vmem:[%s923_s10] sm:$0xff] (!%p665_p10)  ;;  %v733_v28 = vpack.c.bf16 (!%p665_p10), %v319_v23, %v318_v22  ;;  %v735_v29 = vpack.c.bf16 (!%p665_p10), %v337_v25, %v336_v24  ;;  %v321_v31 = vld [vmem:[%s1055_s1 + $0x48] sm:$0xff] (!%p665_p10)  ;;  %v338_v32 = vld [vmem:[%s1055_s1 + $0xd0] sm:$0xff] (!%p665_p10) }
  0x22   : > { %v345_v27 = vcombine.high (!%p665_p10), %v311_v26, %v311_v26  ;;  %v320_v30 = vld [vmem:[%s1055_s1 + $0x40] sm:$0xff] (!%p665_p10)  ;;  %v339_v33 = vld [vmem:[%s1055_s1 + $0xd8] sm:$0xff] (!%p665_p10)  ;;  %v322_v36 = vld [vmem:[%s1055_s1 + $0x50] sm:$0xff] (!%p665_p10) }
  0x23   : > { %726 = vmatpush3.bf16.msra.mxu0 %v725_v14  ;;  %v737_v34 = vpack.c.bf16 %v321_v31, %v320_v30  ;;  %v739_v35 = vpack.c.bf16 %v339_v33, %v338_v32  ;;  %v323_v37 = vld [vmem:[%s1055_s1 + $0x58] sm:$0xff]  ;;  %v340_v38 = vld [vmem:[%s1055_s1 + $0xe0] sm:$0xff]  ;;  %v341_v39 = vld [vmem:[%s1055_s1 + $0xe8] sm:$0xff] }
  0x24   : > { %728 = vmatprep.subr.bf16.mxu0 %v727_v15  ;;  %411 = vmatprep.mubr.f32.mxu0 %v345_v27  ;;  %v741_v40 = vpack.c.bf16 %v323_v37, %v322_v36  ;;  %v743_v41 = vpack.c.bf16 %v341_v39, %v340_v38  ;;  %v324_v42 = vld [vmem:[%s1055_s1 + $0x60] sm:$0xff]  ;;  %v325_v43 = vld [vmem:[%s1055_s1 + $0x68] sm:$0xff]  ;;  %v342_v44 = vld [vmem:[%s1055_s1 + $0xf0] sm:$0xff] }
  0x25   : > { %v343_v45 = vld [vmem:[%s1055_s1 + $0xf8] sm:$0xff]  ;;  %v745_v46 = vpack.c.bf16 %v325_v43, %v324_v42  ;;  %v326_v48 = vld [vmem:[%s1055_s1 + $0x70] sm:$0xff]  ;;  %v417_v55 = vld [vmem:[%s1056_s2] sm:$0xff] }
  0x26   : > { %v747_v47 = vpack.c.bf16 %v343_v45, %v342_v44  ;;  %v327_v49 = vld [vmem:[%s1055_s1 + $0x78] sm:$0xff]  ;;  %v501_v56 = vld [vmem:[#allocation2] sm:$0xff]  ;;  %v504_v58 = vld [vmem:[#allocation3] sm:$0xff] }
  0x27   : > { %730 = vmatpush3.bf16.msra.mxu0 %v729_v20  ;;  %v749_v50 = vpack.c.bf16 %v327_v49, %v326_v48 }
  0x28   : > { %732 = vmatprep.subr.bf16.mxu0 %v731_v21 }
  0x2b   : > { %734 = vmatpush3.bf16.msra.mxu0 %v733_v28 }
  0x2c   : > { %736 = vmatprep.subr.bf16.mxu0 %v735_v29 }
  0x2f   : > { %738 = vmatpush3.bf16.msra.mxu0 %v737_v34 }
  0x30   : > { %740 = vmatprep.subr.bf16.mxu0 %v739_v35 }
  0x33   : > { %742 = vmatpush3.bf16.msra.mxu0 %v741_v40 }
  0x34   : > { %744 = vmatprep.subr.bf16.mxu0 %v743_v41 }
  0x37   : > { %746 = vmatpush3.bf16.msra.mxu0 %v745_v46 }
  0x38   : > { %748 = vmatprep.subr.bf16.mxu0 %v747_v47 }
  0x3b   : > { %750 = vmatpush3.bf16.msra.mxu0 %v749_v50 }
  0x3e   : > { %412 = vmatmul.mubr.f32.vlgmr.msra.gmra.mrb[0].mxu0 %v311_v26 }
 0x111   : > { %v709_v52 = vpop.f32.mrb[0].mxu0 }
 0x112   : > { %v710_v53 = vpop.f32.mrb[1].mxu0 }
 0x113   : > { %v711_v54 = vadd.f32 %v710_v53, %v709_v52 }
 0x115   : > { %715 = vmatpush3.msk.msra.mxu1 %vm422_vm1, %v711_v54 }
 0x116   : > { %717 = vmatmul.mubr.msk.f32.vlgmr.msra.gmra.mrb[0].mxu1 %vm418_vm2, %v417_v55 }
 0x1e9   : > { %v492_v57 = vpop.f32.mrb[0].mxu1 }
 0x1ea   : > { %500 = vst.msk [vmem:[%s498_s12] sm:$0xff] %vm499_vm3, %v492_v57  ;;  %v502_v59 = vadd.f32 %v501_v56, %v492_v57  ;;  %v505_v60 = vmul.f32 %v492_v57, %v492_v57  ;;  %v718_v61 = vpop.f32.mrb[1].mxu1 }
 0x1ec   : > { %503 = vst.msk [vmem:[#allocation2] sm:$0xff] %vm499_vm3, %v502_v59  ;;  %v506_v62 = vadd.f32 %v505_v60, %v504_v58 }
 0x1ee   : > { %507 = vst.msk [vmem:[#allocation3] sm:$0xff] %vm499_vm3, %v506_v62 }
 0x1ef PF: > { %p508_p11 = scmp.eq.s32.totalorder %s821_s18, 1 }
 0x1f1   : > { %p511_p12 = pnand %p508_p11, %p297_p5 }
 0x1f2   : > { %v526_v9 = vld [vmem:[%s1057_s3] sm:$0xff] (!%p511_p12)  ;;  %vm530_vm4 = vcmask (!%p511_p12), 7168  }
 0x1f3   : > { %514 = sbr.rel (%p511_p12) target bundleno = 672 (0x2a0), region = 52  ;;  %v515_v63 = vld [vmem:[#allocation2] sm:$0xff] (!%p511_p12) }
 0x1f4   : > { %516 = vadd.xlane.f32.xlu0 (!%p511_p12), %v515_v63  ;;  %v532_v12 = vld [vmem:[%s1058_s4] sm:$0xff] (!%p511_p12) }
 0x1f5   : > { %v518_v0 = vld [vmem:[#allocation3] sm:$0xff] (!%p511_p12) }
 0x1f8   : > { %519 = vadd.xlane.f32.xlu0 (!%p511_p12), %v518_v0 }
 0x281   : > { %v517_v1 = vpop.xlane.xlu0 %516 }
 0x282   : > { %v521_v2 = vmul.f32 0.0078125, %v517_v1 }
 0x284   : > { %v523_v4 = vmul.f32 %v521_v2, %v521_v2 }
 0x285   : > { %v520_v3 = vpop.xlane.xlu0 %519 }
 0x286   : > { %v522_v5 = vmul.f32 0.0078125, %v520_v3 }
 0x288   : > { %v524_v6 = vsub.f32 %v522_v5, %v523_v4 }
 0x28a   : > { %v525_v7 = vmax.f32 %v524_v6, 0.0 }
 0x28c   : > { %v527_v8 = vadd.f32 1e-05, %v525_v7 }
 0x28e   : > { %796 = vrsqrt.f32 %v527_v8 }
 0x298   : > { %v797_v10 = vpop.eup %796 }
 0x299   : > { %v529_v11 = vmul.f32 %v797_v10, %v526_v9 }
 0x29b   : > { %531 = vst.msk [vmem:[#allocation4] sm:$0xff] %vm530_vm4, %v529_v11  ;;  %v533_v13 = vmul.f32 %v529_v11, %v521_v2 }
 0x29d   : > { %v534_v14 = vsub.f32 %v532_v12, %v533_v13 }
 0x29f   : > { %535 = vst.msk [vmem:[#allocation5] sm:$0xff] %vm530_vm4, %v534_v14 }
 0x2a0 PF: > { %p670_p13 = scmp.ne.s32.totalorder %s825_s19, 1 }
 0x2a1   : > { %v842_v16 = vmov (!%p670_p13), 0   ;;  %s671_s17 = sshll.u32 (!%p670_p13), %s821_s18, 3  ;;  %vm558_vm5 = vcmask (!%p670_p13), 523264  }
 0x2a2   : > { %539 = sbr.rel (%p670_p13) target bundleno = 810 (0x32a), region = 56  ;;  %v544_v15 = vld [vmem:[#allocation4] sm:$0xff] (!%p670_p13)  ;;  %798 = vset.pattern.permute.xlu0 (!%p670_p13), %v842_v16  ;;  %s542_s25 = scalar_lea.vmem (!%p670_p13), [#allocation6], %s671_s17 }
 0x2a3   : > { %547 = vperm.xlu0 (!%p670_p13), %798, %v544_v15   ;;  %v543_v19 = vld [vmem:[%s542_s25] sm:$0xff] (!%p670_p13) }
 0x2a6   : > { %v551_v17 = vld [vmem:[#allocation5] sm:$0xff] (!%p670_p13) }
 0x2a7   : > { %554 = vperm.xlu0 (!%p670_p13), %798, %v551_v17  }
 0x322   : > { %v548_v18 = vpop.permute.xlu0 %547 }
 0x323   : > { %v550_v20 = vmul.f32 %v548_v18, %v543_v19 }
 0x326   : > { %v555_v21 = vpop.permute.xlu0 %554 }
 0x327   : > { %v557_v22 = vadd.f32 %v555_v21, %v550_v20 }
 0x329   : > { %559 = vst.msk [vmem:[%s918_s7] sm:$0xff] %vm558_vm5, %v557_v22 }
 0x32a PF: > { %s15_s22 = sadd.s32 1, %s837_s22   ;;  %s1060_s18 = smov %s829_s20 }
 0x32b   : > { %p12_p0 = scmp.ge.s32.totalorder %s15_s22, 6   ;;  %s1061_s19 = smov %s833_s21 }
 0x32c   : > { %s1062_s20 = smov %s1065_s23  ;;  %s1063_s21 = smov %s1069_s24 }
 0x32d   :  { %14 = sbr.rel (!%p12_p0) target bundleno = 3 (0x3), region = 88 }

</bundles_post_ra>
